<compile_context>
chip_gen: v7x
topology: tpu7x:2x2x1
jax: 0.10.0
libtpu: 0.0.40
codegen_flags: <defaults>
</compile_context>

<pallas_src>
import numpy as np
import jax
import jax.numpy as jnp
from jax.experimental import pallas as pl
from jax.experimental.pallas import tpu as pltpu


def _round_up(a, m):
    return ((a + m - 1) // m) * m


# ----------------------------------------------------------------------------
# Parameter setup (glue, float64): fold one butterfly layer into ONE exact
# dense matrix:  blockdiag_butterfly_multiply(x, w1, w2) == x @ (M1 @ M2).
# (No nonlinearity between the two bmm stages, so the fusion is exact.)
# ----------------------------------------------------------------------------
def butterfly_fused_dense(w1_bfly, w2_bfly):
    w1 = np.asarray(jax.device_get(w1_bfly), dtype=np.float64)
    w2 = np.asarray(jax.device_get(w2_bfly), dtype=np.float64)
    k, q, p = w1.shape
    l, s, r = w2.shape
    n = k * p
    assert l * r == k * q

    # Stage 1: block-diagonal expansion of w1:  (n, k*q)
    m1 = np.zeros((n, k * q), dtype=np.float64)
    for ki in range(k):
        m1[ki * p:(ki + 1) * p, ki * q:(ki + 1) * q] = w1[ki].T          # (p, q)

    # Stage 2: reshape/transpose permutations + second block-diag fused: (k*q, s*l)
    m2 = np.zeros((r, l, s, l), dtype=np.float64)
    for li in range(l):
        m2[:, li, :, li] = w2[li].T                                      # (r, s)
    m2 = m2.reshape(r * l, s * l)

    return m1 @ m2                                                       # (n, s*l) float64


def pad_linear_to_lanes(w3, b3, lane=128):
    """Transpose Linear weights and zero-pad the output dim to a lane multiple."""
    O, Hid = w3.shape
    OP = max(lane, _round_up(O, lane))
    w3t = np.zeros((Hid, OP), dtype=np.float32)
    w3t[:, :O] = np.asarray(jax.device_get(w3)).T
    b3p = np.zeros((1, OP), dtype=np.float32)
    b3p[0, :O] = np.asarray(jax.device_get(b3))
    return w3t, b3p


# ----------------------------------------------------------------------------
# Pallas kernel: one batch tile -> 3 matmuls (f32 MXU accumulation) + 2 relus
# + bias.  x is cast to the compute dtype on the VPU (free).  Weight blocks use
# constant index_maps so they stay resident in VMEM across all grid steps; only
# x / out are streamed (double-buffered by the Pallas pipeline).
# ----------------------------------------------------------------------------
def butterfly_dnn_kernel(x_ref, wa_ref, wb_ref, w3_ref, b3_ref, out_ref):
    cdt = wa_ref.dtype
    x = x_ref[...].astype(cdt)                                           # (TB, N)
    h = jnp.dot(x, wa_ref[...], preferred_element_type=jnp.float32)      # (TB, H1)
    h = jnp.maximum(h, 0.0)                                              # relu (f32)
    h = jnp.dot(h.astype(cdt), wb_ref[...],
                preferred_element_type=jnp.float32)                      # (TB, H2)
    h = jnp.maximum(h, 0.0)                                              # relu (f32)
    out = jnp.dot(h.astype(cdt), w3_ref[...],
                  preferred_element_type=jnp.float32) + b3_ref[...]      # (TB, OP)
    out_ref[...] = out.astype(out_ref.dtype)


def butterfly_dnn_forward(x_nchw, wa, wb, w3t_pad, b3_pad, out_dim, *, block_b=1024):
    """Butterfly_DNN forward.  `wa`/`wb` are fused dense butterfly matrices in the
    compute dtype, `w3t_pad`/`b3_pad` the lane-padded final projection.  x is taken
    in its native dtype and cast inside the kernel (no wrapper-side HBM copy)."""
    cdt = wa.dtype
    B = x_nchw.shape[0]
    x_flat = x_nchw.reshape(B, -1)            # row-major flatten == nn.Flatten (no copy)
    N = x_flat.shape[1]
    H1, H2 = wa.shape[1], wb.shape[1]
    OP = w3t_pad.shape[1]                     # lane-padded output width (128)

    # ---- batch tile ----
    block_b = max(256, _round_up(block_b, 256))
    if B <= 256:
        # tiny batch: one grid step; round rows up to a safe sublane multiple.
        tb = _round_up(max(B, 1), 32)
    else:
        # large batch: 256-multiple tile, capped at block_b (keeps per-step VMEM
        # inside v5e's 16 MiB default scoped limit) and sized so the grid has
        # >= 2 steps, keeping both v7x TensorCores busy on the "parallel" axis.
        tb = min(block_b, _round_up(pl.cdiv(B, 2), 256))

    # Only tiny batches get padded (cheap). For large B the final grid step is a
    # masked partial block; rows are independent so undefined rows never mix into
    # valid ones and OOB stores are dropped.
    x_in, Bp = x_flat, B
    if B < tb:
        x_in = jnp.pad(x_flat, ((0, tb - B), (0, 0)))
        Bp = tb
    grid = (pl.cdiv(Bp, tb),)

    x_item = np.dtype(x_in.dtype).itemsize
    c_item = np.dtype(cdt).itemsize
    cost = pl.CostEstimate(
        flops=2 * Bp * (N * H1 + H1 * H2 + H2 * OP),
        transcendentals=0,
        bytes_accessed=x_item * Bp * N
        + c_item * (N * H1 + H1 * H2 + H2 * OP + Bp * OP) + 4 * OP,
    )

    out = pl.pallas_call(
        butterfly_dnn_kernel,
        # Output in the compute dtype: bf16 path halves write-back bytes; OP=128
        # keeps the stores lane-dense / unmasked.
        out_shape=jax.ShapeDtypeStruct((Bp, OP), cdt),
        grid=grid,
        in_specs=[
            pl.BlockSpec((tb, N), lambda i: (i, 0)),        # x: streamed over batch
            pl.BlockSpec(wa.shape, lambda i: (0, 0)),       # fused layer1 (VMEM-resident)
            pl.BlockSpec(wb.shape, lambda i: (0, 0)),       # fused layer2 (VMEM-resident)
            pl.BlockSpec(w3t_pad.shape, lambda i: (0, 0)),  # padded Linear W^T (resident)
            pl.BlockSpec(b3_pad.shape, lambda i: (0, 0)),   # padded bias, f32 (resident)
        ],
        out_specs=pl.BlockSpec((tb, OP), lambda i: (i, 0)),
        compiler_params=pltpu.CompilerParams(
            dimension_semantics=("parallel",),              # shards steps across v7x TCs
            vmem_limit_bytes=32 * 1024 * 1024,              # headroom for tb=1024 on v5e
        ),
        cost_estimate=cost,
    )(x_in, wa, wb, w3t_pad, b3_pad)

    return out[:B, :out_dim]


# ----------------------------------------------------------------------------
# Pure-JAX reference (mirrors BlockdiagButterflyMultiply.forward), run at
# HIGHEST matmul precision so the comparison isolates kernel error.
# ----------------------------------------------------------------------------
def blockdiag_butterfly_ref(x, w1_bfly, w2_bfly):
    B, n = x.shape
    k, q, p = w1_bfly.shape
    l, s, r = w2_bfly.shape
    hp = jax.lax.Precision.HIGHEST
    out1 = jnp.einsum('bkp,kqp->bkq', x.reshape(B, k, p), w1_bfly, precision=hp)
    out1 = out1.reshape(B, r, l).transpose(0, 2, 1)                  # (B, l, r)
    out2 = jnp.einsum('blr,lsr->bls', out1, w2_bfly, precision=hp)   # (B, l, s)
    return out2.transpose(0, 2, 1).reshape(B, s * l)                 # (B, s*l)


def butterfly_dnn_ref(x_nchw, w1a, w2a, w1b, w2b, w3, b3):
    x = x_nchw.reshape(x_nchw.shape[0], -1)
    x = jax.nn.relu(blockdiag_butterfly_ref(x, w1a, w2a))
    x = jax.nn.relu(blockdiag_butterfly_ref(x, w1b, w2b))
    return jnp.dot(x, w3.T, precision=jax.lax.Precision.HIGHEST) + b3


def blockdiag_butterfly_np(x, w1_bfly, w2_bfly):
    """float64 numpy mirror of BlockdiagButterflyMultiply.forward (exactness check)."""
    B, n = x.shape
    k, q, p = w1_bfly.shape
    l, s, r = w2_bfly.shape
    out1 = np.einsum('bkp,kqp->bkq', x.reshape(B, k, p), w1_bfly)
    out1 = out1.reshape(B, r, l).transpose(0, 2, 1)
    out2 = np.einsum('blr,lsr->bls', out1, w2_bfly)
    return out2.transpose(0, 2, 1).reshape(B, s * l)


# ----------------------------------------------------------------------------
if __name__ == "__main__":
    # Butterfly_DNN(input_size=256, hidden_size=128, output_size=10):
    #   layer1: ButterflyBlockDiagLayer(256, q=4, p=16, s=8, r=4) -> k=16, l=16
    #   layer2: ButterflyBlockDiagLayer(128, q=4, p=4,  s=4, r=4) -> k=32, l=32
    #   layer3: Linear(128, 10)
    # input image (B, 1, 16, 16) -> input_size = 256, hidden_size = 128
    B, C, Himg, Wimg = 2, 1, 16, 16
    input_size = C * Himg * Wimg          # 256
    hidden_size = input_size // 2         # 128 = s*l of layer1
    output_size = 10

    key = jax.random.PRNGKey(0)
    ks = jax.random.split(key, 7)
    x = jax.random.normal(ks[0], (B, C, Himg, Wimg), jnp.float32)

    w1a = jax.random.normal(ks[1], (16, 4, 16), jnp.float32)   # (k, q, p)
    w2a = jax.random.normal(ks[2], (16, 8, 4), jnp.float32)    # (l, s, r)
    w1b = jax.random.normal(ks[3], (32, 4, 4), jnp.float32)
    w2b = jax.random.normal(ks[4], (32, 4, 4), jnp.float32)
    w3 = jax.random.normal(ks[5], (output_size, hidden_size), jnp.float32) / np.sqrt(hidden_size)
    b3 = jax.random.normal(ks[6], (output_size,), jnp.float32) * 0.1

    # Parameter setup (float64): exact algebraic fusion + lane-dense padding.
    ma64 = butterfly_fused_dense(w1a, w2a)             # (256, 128)
    mb64 = butterfly_fused_dense(w1b, w2b)             # (128, 128)
    w3t_pad, b3_pad = pad_linear_to_lanes(w3, b3)      # (128, 128), (1, 128)

    # Structural exactness check of the fusion in float64: catches any permutation
    # bug in the m1/m2 construction with certainty (independent of TPU matmul noise).
    rng = np.random.default_rng(0)
    w1a64, w2a64 = np.asarray(w1a, np.float64), np.asarray(w2a, np.float64)
    w1b64, w2b64 = np.asarray(w1b, np.float64), np.asarray(w2b, np.float64)
    t1 = rng.standard_normal((8, input_size))
    np.testing.assert_allclose(t1 @ ma64, blockdiag_butterfly_np(t1, w1a64, w2a64),
                               rtol=1e-12, atol=1e-9)
    t2 = rng.standard_normal((8, hidden_size))
    np.testing.assert_allclose(t2 @ mb64, blockdiag_butterfly_np(t2, w1b64, w2b64),
                               rtol=1e-12, atol=1e-9)

    ref = jax.block_until_ready(butterfly_dnn_ref(x, w1a, w2a, w1b, w2b, w3, b3))

    # --- f32 path (exact fused weights) ---
    out_f32 = butterfly_dnn_forward(
        x, jnp.asarray(ma64, jnp.float32), jnp.asarray(mb64, jnp.float32),
        jnp.asarray(w3t_pad), jnp.asarray(b3_pad), output_size)
    out_f32 = jax.block_until_ready(out_f32)
    assert out_f32.shape == (B, output_size)
    assert out_f32.dtype == jnp.float32
    # rtol tightened 20x vs. the previous version; atol leaves room for TPU
    # matmul-pass rounding on O(10) logits.  Structural exactness of the fusion is
    # enforced by the float64 check above.
    np.testing.assert_allclose(np.asarray(out_f32), np.asarray(ref),
                               rtol=1e-3, atol=3e-1)

    # --- bf16 weights/activations, f32 accumulation, bf16 output ---
    # (bandwidth / MXU win on every generation, incl. v5e whose MXU is bf16-native)
    out_bf16 = butterfly_dnn_forward(
        x, jnp.asarray(ma64, jnp.bfloat16), jnp.asarray(mb64, jnp.bfloat16),
        jnp.asarray(w3t_pad, jnp.bfloat16), jnp.asarray(b3_pad), output_size)
    out_bf16 = jax.block_until_ready(out_bf16)
    assert out_bf16.shape == (B, output_size)
    assert out_bf16.dtype == jnp.bfloat16
    np.testing.assert_allclose(np.asarray(out_bf16.astype(jnp.float32)), np.asarray(ref),
                               rtol=5e-2, atol=1.0)

    print("KERNEL_OK")
</pallas_src>

<mosaic_0001>
module attributes {stable_mosaic.version = 11 : i64} {
  func.func @butterfly_dnn_kernel(%arg0: i32, %arg1: memref<32x256xf32, #tpu.memory_space<vmem>>, %arg2: memref<256x128xf32, #tpu.memory_space<vmem>>, %arg3: memref<128x128xf32, #tpu.memory_space<vmem>>, %arg4: memref<128x128xf32, #tpu.memory_space<vmem>>, %arg5: memref<1x128xf32, #tpu.memory_space<vmem>>, %arg6: memref<32x128xf32, #tpu.memory_space<vmem>>) attributes {dimension_semantics = [#tpu.dimension_semantics<parallel>], iteration_bounds = array<i64: 1>, scalar_prefetch = 0 : i64, scratch_operands = 0 : i64, tpu.core_type = #tpu.core_type<tc>, window_params = [{transform_indices = @transform_0, window_bounds = array<i64: 32, 256>}, {pipeline_mode = #tpu.pipeline_mode<synchronous>, transform_indices = @transform_1, window_bounds = array<i64: 256, 128>}, {pipeline_mode = #tpu.pipeline_mode<synchronous>, transform_indices = @transform_2, window_bounds = array<i64: 128, 128>}, {pipeline_mode = #tpu.pipeline_mode<synchronous>, transform_indices = @transform_3, window_bounds = array<i64: 128, 128>}, {pipeline_mode = #tpu.pipeline_mode<synchronous>, transform_indices = @transform_4, window_bounds = array<i64: 1, 128>}, {transform_indices = @transform_5, window_bounds = array<i64: 32, 128>}]} {
    %c0 = arith.constant 0 : index
    %c0_0 = arith.constant 0 : index
    %0 = vector.load %arg1[%c0, %c0_0] : memref<32x256xf32, #tpu.memory_space<vmem>>, vector<32x256xf32>
    %c0_1 = arith.constant 0 : index
    %c0_2 = arith.constant 0 : index
    %1 = vector.load %arg2[%c0_1, %c0_2] : memref<256x128xf32, #tpu.memory_space<vmem>>, vector<256x128xf32>
    %cst = arith.constant dense<0.000000e+00> : vector<32x128xf32>
    %2 = tpu.matmul %0, %1, %cst {dimension_numbers = #tpu.dot_dimension_numbers<[1], [0], [0], [1], [0, 0, 1, 1], [], []>} : vector<32x256xf32>, vector<256x128xf32>, vector<32x128xf32> -> vector<32x128xf32>
    %cst_3 = arith.constant 0.000000e+00 : f32
    %3 = vector.broadcast %cst_3 : f32 to vector<32x128xf32>
    %4 = arith.maximumf %2, %3 : vector<32x128xf32>
    %c0_4 = arith.constant 0 : index
    %c0_5 = arith.constant 0 : index
    %5 = vector.load %arg3[%c0_4, %c0_5] : memref<128x128xf32, #tpu.memory_space<vmem>>, vector<128x128xf32>
    %cst_6 = arith.constant dense<0.000000e+00> : vector<32x128xf32>
    %6 = tpu.matmul %4, %5, %cst_6 {dimension_numbers = #tpu.dot_dimension_numbers<[1], [0], [0], [1], [0, 0, 1, 1], [], []>} : vector<32x128xf32>, vector<128x128xf32>, vector<32x128xf32> -> vector<32x128xf32>
    %cst_7 = arith.constant 0.000000e+00 : f32
    %7 = vector.broadcast %cst_7 : f32 to vector<32x128xf32>
    %8 = arith.maximumf %6, %7 : vector<32x128xf32>
    %c0_8 = arith.constant 0 : index
    %c0_9 = arith.constant 0 : index
    %9 = vector.load %arg4[%c0_8, %c0_9] : memref<128x128xf32, #tpu.memory_space<vmem>>, vector<128x128xf32>
    %cst_10 = arith.constant dense<0.000000e+00> : vector<32x128xf32>
    %10 = tpu.matmul %8, %9, %cst_10 {dimension_numbers = #tpu.dot_dimension_numbers<[1], [0], [0], [1], [0, 0, 1, 1], [], []>} : vector<32x128xf32>, vector<128x128xf32>, vector<32x128xf32> -> vector<32x128xf32>
    %c0_11 = arith.constant 0 : index
    %c0_12 = arith.constant 0 : index
    %11 = vector.load %arg5[%c0_11, %c0_12] : memref<1x128xf32, #tpu.memory_space<vmem>>, vector<1x128xf32>
    %12 = vector.broadcast %11 : vector<1x128xf32> to vector<32x128xf32>
    %13 = arith.addf %10, %12 : vector<32x128xf32>
    %c0_13 = arith.constant 0 : index
    %c0_14 = arith.constant 0 : index
    %14 = vector.load %arg6[%c0_13, %c0_14] : memref<32x128xf32, #tpu.memory_space<vmem>>, vector<32x128xf32>
    tpu.vector_store %arg6[%c0_13, %c0_14], %13 {strides = array<i32>} : memref<32x128xf32, #tpu.memory_space<vmem>>, vector<32x128xf32>,
    return
  }
  func.func @transform_0(%arg0: i32) -> (i32, i32) {
    %c0_i32 = arith.constant 0 : i32
    %c0_i32_0 = arith.constant 0 : i32
    return %arg0, %c0_i32 : i32, i32
  }
  func.func @transform_1(%arg0: i32) -> (i32, i32) {
    %c0_i32 = arith.constant 0 : i32
    %c0_i32_0 = arith.constant 0 : i32
    %c0_i32_1 = arith.constant 0 : i32
    return %c0_i32, %c0_i32_0 : i32, i32
  }
  func.func @transform_2(%arg0: i32) -> (i32, i32) {
    %c0_i32 = arith.constant 0 : i32
    %c0_i32_0 = arith.constant 0 : i32
    %c0_i32_1 = arith.constant 0 : i32
    return %c0_i32, %c0_i32_0 : i32, i32
  }
  func.func @transform_3(%arg0: i32) -> (i32, i32) {
    %c0_i32 = arith.constant 0 : i32
    %c0_i32_0 = arith.constant 0 : i32
    %c0_i32_1 = arith.constant 0 : i32
    return %c0_i32, %c0_i32_0 : i32, i32
  }
  func.func @transform_4(%arg0: i32) -> (i32, i32) {
    %c0_i32 = arith.constant 0 : i32
    %c0_i32_0 = arith.constant 0 : i32
    %c0_i32_1 = arith.constant 0 : i32
    return %c0_i32, %c0_i32_0 : i32, i32
  }
  func.func @transform_5(%arg0: i32) -> (i32, i32) {
    %c0_i32 = arith.constant 0 : i32
    %c0_i32_0 = arith.constant 0 : i32
    return %arg0, %c0_i32 : i32, i32
  }
}

</mosaic_0001>

<bundles_post_ra>
// kernel: tpu_custom_call.1
= control target key start
LH: loop header
LB: loop body
LE: loop exit
PB: predicated region body
PF: predicated region fallthrough
CT: control target
= control target key end

     0   :  { %10 = vsyncpa [#allocation3], 0  ;;  %s962_s0 = inlined_call_operand.hbm [shape: f32[32,256], index: 0, kind: input, shape index: {}]   ;;  %s963_s1 = inlined_call_operand.hbm [shape: f32[256,128], index: 1, kind: input, shape index: {}]   ;;  %s964_s2 = inlined_call_operand.hbm [shape: f32[128,128], index: 2, kind: input, shape index: {}]   ;;  %s965_s3 = inlined_call_operand.hbm [shape: f32[128,128], index: 3, kind: input, shape index: {}]   ;;  %s966_s4 = inlined_call_operand.vmem [shape: f32[1,128], index: 4, kind: input, shape index: {}]   ;;  %s967_s5 = inlined_call_operand.hbm [shape: f32[32,128], index: 5, kind: output, shape index: {}]  }
   0x1   :  { %11 = vsyncpa [#allocation6], 0 }
   0x2   :  { %12 = vsyncpa [#allocation9], 0 }
   0x3   :  { %13 = vsyncpa [#allocation4], 0  ;;  %s841_s18 = smov [#allocation5]   ;;  %s723_s22 = scalar_lea.hbm %s963_s1, 4096 }
   0x4   :  { %s31_s19 = sshll.u32 %s841_s18, 4  ;;  %p724_p0 = scmp.ne.s32.totalorder %s963_s1, %s723_s22  ;;  %s32_s19 = int_to_ptr.vmem [resolvable:$true] %s31_s19 }
   0x5   :  { %p727_p1 = scmp.lt.u32.totalorder %s723_s22, %s963_s1 }
   0x7   :  { %p729_p2 = pnand %p727_p1, %p724_p0 }
   0x9   :  { %732 = shalt.err (!%p729_p2)
}
   0xa   :  { %s733_s27 = scalar_lea.vmem %s32_s19, 4096  ;;  %p738_p4 = scmp.lt.s32.totalorder %s32_s19, %s32_s19 }
   0xb   :  { %p734_p3 = scmp.ne.s32.totalorder %s32_s19, %s733_s27  ;;  %p739_p5 = scmp.lt.s32.totalorder %s733_s27, %s733_s27 }
   0xd   :  { %p740_p6 = por %p739_p5, %p738_p4 }
   0xf   :  { %p741_p7 = pnand %p740_p6, %p734_p3 }
  0x11   :  { %744 = shalt.err (!%p741_p7)
}
  0x12   :  { %s842_s28 = smov 128   ;;  %s843_s29 = smov 8  }
  0x13   :  { %37 = dma.hbm_to_vmem [thread:$0]  %s963_s1, 4096, %s32_s19, [#allocation6], %s842_s28, %s842_s28, %s843_s29  }
  0x14   :  { %s844_s7 = smov [#allocation2]   ;;  %s745_s11 = scalar_lea.hbm %s962_s0, 1024 }
  0x15   :  { %s19_s8 = sshll.u32 %s844_s7, 4  ;;  %p746_p8 = scmp.ne.s32.totalorder %s962_s0, %s745_s11  ;;  %s20_s8 = int_to_ptr.vmem [resolvable:$true] %s19_s8 }
  0x16   :  { %p749_p9 = scmp.lt.u32.totalorder %s745_s11, %s962_s0 }
  0x18   :  { %p751_p10 = pnand %p749_p9, %p746_p8 }
  0x1a   :  { %754 = shalt.err (!%p751_p10)
}
  0x1b   :  { %s755_s16 = scalar_lea.vmem %s20_s8, 1024  ;;  %p760_p12 = scmp.lt.s32.totalorder %s20_s8, %s20_s8 }
  0x1c   :  { %p756_p11 = scmp.ne.s32.totalorder %s20_s8, %s755_s16  ;;  %p761_p13 = scmp.lt.s32.totalorder %s755_s16, %s755_s16 }
  0x1e   :  { %p762_p0 = por %p761_p13, %p760_p12 }
  0x20   :  { %p763_p1 = pnand %p762_p0, %p756_p11 }
  0x22   :  { %766 = shalt.err (!%p763_p1)
}
  0x23   :  { %s845_s1 = smov 256   ;;  %s846_s17 = smov 16  }
  0x24   :  { %25 = dma.hbm_to_vmem [thread:$0]  %s962_s0, 1024, %s20_s8, [#allocation3], %s845_s1, %s845_s1, %s846_s17  }
  0x25   :  { %s847_s20 = smov [#allocation7]   ;;  %s848_s22 = smov [#allocation8]  }
  0x26   :  { %s43_s21 = sshll.u32 %s847_s20, 4  ;;  %s55_s23 = sshll.u32 %s848_s22, 4  ;;  %s44_s21 = int_to_ptr.vmem [resolvable:$true] %s43_s21  ;;  %s907_s23 = int_to_ptr.vmem [resolvable:$true] %s55_s23 }
  0x27   :  { %s767_s26 = scalar_lea.hbm %s964_s2, 2048 }
  0x28   :  { %p768_p2 = scmp.ne.s32.totalorder %s964_s2, %s767_s26  ;;  %p771_p3 = scmp.lt.u32.totalorder %s767_s26, %s964_s2 }
  0x2a   :  { %p773_p4 = pnand %p771_p3, %p768_p2 }
  0x2c   :  { %776 = shalt.err (!%p773_p4)
}
  0x2d   :  { %s777_s0 = scalar_lea.vmem %s44_s21, 2048  ;;  %p782_p6 = scmp.lt.s32.totalorder %s44_s21, %s44_s21 }
  0x2e   :  { %p778_p5 = scmp.ne.s32.totalorder %s44_s21, %s777_s0  ;;  %p783_p7 = scmp.lt.s32.totalorder %s777_s0, %s777_s0 }
  0x30   :  { %p784_p8 = por %p783_p7, %p782_p6 }
  0x32   :  { %p785_p9 = pnand %p784_p8, %p778_p5 }
  0x34   :  { %788 = shalt.err (!%p785_p9)
}
  0x35   :  { %49 = dma.hbm_to_vmem [thread:$0]  %s964_s2, 2048, %s44_s21, [#allocation6], %s842_s28, %s842_s28, %s843_s29  }
  0x36   :  { %s789_s12 = scalar_lea.hbm %s965_s3, 2048 }
  0x37   :  { %p790_p10 = scmp.ne.s32.totalorder %s965_s3, %s789_s12  ;;  %p793_p11 = scmp.lt.u32.totalorder %s789_s12, %s965_s3 }
  0x39   :  { %p795_p12 = pnand %p793_p11, %p790_p10 }
  0x3b   :  { %798 = shalt.err (!%p795_p12)
}
  0x3c   :  { %s799_s1 = scalar_lea.vmem %s907_s23, 2048  ;;  %p804_p0 = scmp.lt.s32.totalorder %s907_s23, %s907_s23 }
  0x3d   :  { %p800_p13 = scmp.ne.s32.totalorder %s907_s23, %s799_s1  ;;  %p805_p1 = scmp.lt.s32.totalorder %s799_s1, %s799_s1 }
  0x3f   :  { %p806_p2 = por %p805_p1, %p804_p0 }
  0x41   :  { %p807_p3 = pnand %p806_p2, %p800_p13 }
  0x43   :  { %810 = shalt.err (!%p807_p3)
}
  0x44   :  { %61 = dma.hbm_to_vmem [thread:$0]  %s965_s3, 2048, %s907_s23, [#allocation9], %s842_s28, %s842_s28, %s843_s29  }
  0x45   :  { %833 = dma.done.wait [#allocation3], 1024  }
  0x46   :  { %834 = vsyncadd [#allocation3], 4294966272 }
  0x47   :  { %835 = dma.done.wait [#allocation6], 6144  }
  0x48   :  { %836 = vsyncadd [#allocation6], 4294961152 }
  0x49   :  { %837 = dma.done.wait [#allocation9], 2048  }
  0x4a   :  { %838 = vsyncadd [#allocation9], 4294965248  ;;  %v100_v0 = vld [vmem:[#allocation5 + $0x80] sm:$0xff]  ;;  %v101_v1 = vld [vmem:[#allocation5 + $0x88] sm:$0xff]  ;;  %s849_s19 = smov [#allocation10]  }
  0x4b   :  { %v84_v2 = vld [vmem:[#allocation5] sm:$0xff]  ;;  %v602_v3 = vpack.c.bf16 %v101_v1, %v100_v0  ;;  %v85_v4 = vld [vmem:[#allocation5 + $0x8] sm:$0xff]  ;;  %v102_v5 = vld [vmem:[#allocation5 + $0x90] sm:$0xff]  ;;  %s427_s20 = sshll.u32 %s849_s19, 4  ;;  %s428_s20 = int_to_ptr.vmem [resolvable:$true] %s427_s20 }
  0x4c   :  { %v103_v6 = vld [vmem:[#allocation5 + $0x98] sm:$0xff]  ;;  %v604_v7 = vpack.c.bf16 %v85_v4, %v84_v2  ;;  %v86_v9 = vld [vmem:[#allocation5 + $0x10] sm:$0xff]  ;;  %v104_v11 = vld [vmem:[#allocation5 + $0xa0] sm:$0xff]  ;;  %s811_s21 = scalar_lea.vmem %s428_s20, 512  ;;  %p816_p5 = scmp.lt.s32.totalorder %s428_s20, %s428_s20 }
  0x4d   :  { %v606_v8 = vpack.c.bf16 %v103_v6, %v102_v5  ;;  %v87_v10 = vld [vmem:[#allocation5 + $0x18] sm:$0xff]  ;;  %603 = vmatprep.subr.bf16.mxu0 %v602_v3  ;;  %v105_v12 = vld [vmem:[#allocation5 + $0xa8] sm:$0xff]  ;;  %v88_v15 = vld [vmem:[#allocation5 + $0x20] sm:$0xff]  ;;  %p812_p4 = scmp.ne.s32.totalorder %s428_s20, %s811_s21  ;;  %p817_p6 = scmp.lt.s32.totalorder %s811_s21, %s811_s21 }
  0x4e   :  { %605 = vmatpush3.bf16.msra.mxu0 %v604_v7  ;;  %v608_v13 = vpack.c.bf16 %v87_v10, %v86_v9  ;;  %v610_v14 = vpack.c.bf16 %v105_v12, %v104_v11  ;;  %v89_v16 = vld [vmem:[#allocation5 + $0x28] sm:$0xff]  ;;  %v106_v17 = vld [vmem:[#allocation5 + $0xb0] sm:$0xff]  ;;  %v107_v18 = vld [vmem:[#allocation5 + $0xb8] sm:$0xff] }
  0x4f   :  { %607 = vmatprep.subr.bf16.mxu0 %v606_v8  ;;  %v612_v19 = vpack.c.bf16 %v89_v16, %v88_v15  ;;  %v614_v20 = vpack.c.bf16 %v107_v18, %v106_v17  ;;  %v90_v21 = vld [vmem:[#allocation5 + $0x30] sm:$0xff]  ;;  %v91_v22 = vld [vmem:[#allocation5 + $0x38] sm:$0xff]  ;;  %v108_v23 = vld [vmem:[#allocation5 + $0xc0] sm:$0xff]  ;;  %p818_p7 = por %p817_p6, %p816_p5 }
  0x50   :  { %v109_v24 = vld [vmem:[#allocation5 + $0xc8] sm:$0xff]  ;;  %v616_v26 = vpack.c.bf16 %v91_v22, %v90_v21  ;;  %v92_v27 = vld [vmem:[#allocation5 + $0x40] sm:$0xff]  ;;  %v110_v30 = vld [vmem:[#allocation5 + $0xd0] sm:$0xff] }
  0x51   :  { %v77_v25 = vld [vmem:[#allocation2 + $0x8] sm:$0xff]  ;;  %v618_v29 = vpack.c.bf16 %v109_v24, %v108_v23  ;;  %v205_v31 = vld [vmem:[#allocation7] sm:$0xff]  ;;  %v111_v33 = vld [vmem:[#allocation5 + $0xd8] sm:$0xff]  ;;  %p819_p8 = pnand %p818_p7, %p812_p4 }
  0x52   :  { %609 = vmatpush3.bf16.msra.mxu0 %v608_v13  ;;  %180 = vmatprep.mubr.f32.mxu0 %v77_v25  ;;  %v93_v28 = vld [vmem:[#allocation5 + $0x48] sm:$0xff]  ;;  %v207_v35 = vld [vmem:[#allocation7 + $0x10] sm:$0xff]  ;;  %v208_v36 = vld [vmem:[#allocation7 + $0x18] sm:$0xff]  ;;  %v622_v41 = vpack.c.bf16 %v111_v33, %v110_v30 }
  0x53   :  { %611 = vmatprep.subr.bf16.mxu0 %v610_v14  ;;  %v206_v32 = vld [vmem:[#allocation7 + $0x8] sm:$0xff]  ;;  %v638_v37 = vpack.c.bf16 %v208_v36, %v207_v35  ;;  %v209_v38 = vld [vmem:[#allocation7 + $0x20] sm:$0xff]  ;;  %v620_v40 = vpack.c.bf16 %v93_v28, %v92_v27  ;;  %v94_v42 = vld [vmem:[#allocation5 + $0x50] sm:$0xff] }
  0x54   :  { %v634_v34 = vpack.c.bf16 %v206_v32, %v205_v31  ;;  %v210_v39 = vld [vmem:[#allocation7 + $0x28] sm:$0xff]  ;;  %v95_v43 = vld [vmem:[#allocation5 + $0x58] sm:$0xff]  ;;  %v112_v44 = vld [vmem:[#allocation5 + $0xe0] sm:$0xff] }
  0x55   :  { %v113_v45 = vld [vmem:[#allocation5 + $0xe8] sm:$0xff]  ;;  %v642_v46 = vpack.c.bf16 %v210_v39, %v209_v38  ;;  %v211_v47 = vld [vmem:[#allocation7 + $0x30] sm:$0xff]  ;;  %v212_v48 = vld [vmem:[#allocation7 + $0x38] sm:$0xff]  ;;  %v624_v49 = vpack.c.bf16 %v95_v43, %v94_v42 }
  0x56   :  { %613 = vmatpush3.bf16.msra.mxu0 %v612_v19  ;;  %635 = vmatprep.subr.bf16.mxu1 %v634_v34  ;;  %v626_v50 = vpack.c.bf16 %v113_v45, %v112_v44  ;;  %v96_v51 = vld [vmem:[#allocation5 + $0x60] sm:$0xff]  ;;  %v97_v52 = vld [vmem:[#allocation5 + $0x68] sm:$0xff]  ;;  %v114_v53 = vld [vmem:[#allocation5 + $0xf0] sm:$0xff]  ;;  %v646_v55 = vpack.c.bf16 %v212_v48, %v211_v47 }
  0x57   :  { %615 = vmatprep.subr.bf16.mxu0 %v614_v20  ;;  %637 = vmatpush3.bf16.msra.mxu1 %v634_v34  ;;  %v115_v54 = vld [vmem:[#allocation5 + $0xf8] sm:$0xff]  ;;  %v213_v56 = vld [vmem:[#allocation7 + $0x40] sm:$0xff]  ;;  %v214_v57 = vld [vmem:[#allocation7 + $0x48] sm:$0xff]  ;;  %v628_v58 = vpack.c.bf16 %v97_v52, %v96_v51 }
  0x58   :  { %639 = vmatprep.subr.bf16.mxu1 %v638_v37  ;;  %v630_v59 = vpack.c.bf16 %v115_v54, %v114_v53  ;;  %v98_v60 = vld [vmem:[#allocation5 + $0x70] sm:$0xff]  ;;  %v99_v61 = vld [vmem:[#allocation5 + $0x78] sm:$0xff]  ;;  %v650_v62 = vpack.c.bf16 %v214_v57, %v213_v56  ;;  %v76_v3 = vld [vmem:[#allocation2] sm:$0xff] }
  0x59   :  { %v215_v63 = vld [vmem:[#allocation7 + $0x50] sm:$0xff]  ;;  %v216_v0 = vld [vmem:[#allocation7 + $0x58] sm:$0xff]  ;;  %v632_v1 = vpack.c.bf16 %v99_v61, %v98_v60  ;;  %v81_v6 = vld [vmem:[#allocation2 + $0x28] sm:$0xff] }
  0x5a   :  { %617 = vmatpush3.bf16.msra.mxu0 %v616_v26  ;;  %v654_v2 = vpack.c.bf16 %v216_v0, %v215_v63  ;;  %v79_v4 = vld [vmem:[#allocation2 + $0x18] sm:$0xff]  ;;  %v78_v5 = vld [vmem:[#allocation2 + $0x10] sm:$0xff]  ;;  %v80_v7 = vld [vmem:[#allocation2 + $0x20] sm:$0xff] }
  0x5b   :  { %619 = vmatprep.subr.bf16.mxu0 %v618_v29  ;;  %641 = vmatpush3.bf16.msra.mxu1 %v638_v37  ;;  %v83_v8 = vld [vmem:[#allocation2 + $0x38] sm:$0xff]  ;;  %v82_v9 = vld [vmem:[#allocation2 + $0x30] sm:$0xff]  ;;  %v217_v10 = vld [vmem:[#allocation7 + $0x60] sm:$0xff] }
  0x5c   :  { %643 = vmatprep.subr.bf16.mxu1 %v642_v46  ;;  %v218_v11 = vld [vmem:[#allocation7 + $0x68] sm:$0xff]  ;;  %v219_v13 = vld [vmem:[#allocation7 + $0x70] sm:$0xff]  ;;  %v220_v14 = vld [vmem:[#allocation7 + $0x78] sm:$0xff] }
  0x5d   :  { %v658_v12 = vpack.c.bf16 %v218_v11, %v217_v10  ;;  %v662_v15 = vpack.c.bf16 %v220_v14, %v219_v13  ;;  %v310_v16 = vld [vmem:[#allocation8] sm:$0xff]  ;;  %v311_v17 = vld [vmem:[#allocation8 + $0x8] sm:$0xff]  ;;  %v312_v18 = vld [vmem:[#allocation8 + $0x10] sm:$0xff] }
  0x5e   :  { %621 = vmatpush3.bf16.msra.mxu0 %v620_v40  ;;  %v666_v19 = vpack.c.bf16 %v311_v17, %v310_v16  ;;  %v313_v20 = vld [vmem:[#allocation8 + $0x18] sm:$0xff]  ;;  %v314_v22 = vld [vmem:[#allocation8 + $0x20] sm:$0xff]  ;;  %v315_v23 = vld [vmem:[#allocation8 + $0x28] sm:$0xff] }
  0x5f   :  { %623 = vmatprep.subr.bf16.mxu0 %v622_v41  ;;  %645 = vmatpush3.bf16.msra.mxu1 %v642_v46  ;;  %v670_v21 = vpack.c.bf16 %v313_v20, %v312_v18  ;;  %v674_v24 = vpack.c.bf16 %v315_v23, %v314_v22  ;;  %v316_v25 = vld [vmem:[#allocation8 + $0x30] sm:$0xff]  ;;  %v317_v26 = vld [vmem:[#allocation8 + $0x38] sm:$0xff]  ;;  %v318_v28 = vld [vmem:[#allocation8 + $0x40] sm:$0xff] }
  0x60   :  { %647 = vmatprep.subr.bf16.mxu1 %v646_v55  ;;  %v678_v27 = vpack.c.bf16 %v317_v26, %v316_v25  ;;  %v319_v29 = vld [vmem:[#allocation8 + $0x48] sm:$0xff]  ;;  %v320_v31 = vld [vmem:[#allocation8 + $0x50] sm:$0xff]  ;;  %v321_v32 = vld [vmem:[#allocation8 + $0x58] sm:$0xff] }
  0x61   :  { %v682_v30 = vpack.c.bf16 %v319_v29, %v318_v28  ;;  %v686_v33 = vpack.c.bf16 %v321_v32, %v320_v31  ;;  %v322_v34 = vld [vmem:[#allocation8 + $0x60] sm:$0xff]  ;;  %v323_v35 = vld [vmem:[#allocation8 + $0x68] sm:$0xff]  ;;  %v324_v53 = vld [vmem:[#allocation8 + $0x70] sm:$0xff] }
  0x62   :  { %625 = vmatpush3.bf16.msra.mxu0 %v624_v49  ;;  %v690_v36 = vpack.c.bf16 %v323_v35, %v322_v34  ;;  %v325_v54 = vld [vmem:[#allocation8 + $0x78] sm:$0xff]  ;;  %v441_v0 = vld [vmem:[%s966_s4] ss:$0 sm:$0xff] }
  0x63   :  { %627 = vmatprep.subr.bf16.mxu0 %v626_v50  ;;  %649 = vmatpush3.bf16.msra.mxu1 %v646_v55  ;;  %v694_v55 = vpack.c.bf16 %v325_v54, %v324_v53 }
  0x64   :  { %651 = vmatprep.subr.bf16.mxu1 %v650_v62 }
  0x66   :  { %629 = vmatpush3.bf16.msra.mxu0 %v628_v58 }
  0x67   :  { %631 = vmatprep.subr.bf16.mxu0 %v630_v59  ;;  %653 = vmatpush3.bf16.msra.mxu1 %v650_v62 }
  0x68   :  { %655 = vmatprep.subr.bf16.mxu1 %v654_v2 }
  0x6a   :  { %633 = vmatpush3.bf16.msra.mxu0 %v632_v1 }
  0x6b   :  { %657 = vmatpush3.bf16.msra.mxu1 %v654_v2  ;;  %667 = vmatprep.subr.bf16.mxu0 %v666_v19 }
  0x6c   :  { %659 = vmatprep.subr.bf16.mxu1 %v658_v12 }
  0x6d   :  { %181 = vmatmul.mubr.f32.vlgmr.msra.gmra.mrb[0].mxu0 %v76_v3 }
  0x6e   :  { %185 = vmatprep.mubr.f32.mxu0 %v79_v4  ;;  %669 = vmatpush3.bf16.msra.mxu0 %v666_v19 }
  0x6f   :  { %661 = vmatpush3.bf16.msra.mxu1 %v658_v12  ;;  %671 = vmatprep.subr.bf16.mxu0 %v670_v21 }
  0x70   :  { %663 = vmatprep.subr.bf16.mxu1 %v662_v15 }
  0x71   :  { %186 = vmatmul.mubr.f32.gmra.mrb[2].mxu0 %v78_v5 }
  0x72   :  { %190 = vmatprep.mubr.f32.mxu0 %v81_v6  ;;  %673 = vmatpush3.bf16.msra.mxu0 %v670_v21 }
  0x73   :  { %665 = vmatpush3.bf16.msra.mxu1 %v662_v15  ;;  %675 = vmatprep.subr.bf16.mxu0 %v674_v24 }
  0x74   :  { %698 = vmatprep.subr.bf16.mxu1 %v666_v19 }
  0x75   :  { %191 = vmatmul.mubr.f32.gmra.mrb[4].mxu0 %v80_v7 }
  0x76   :  { %195 = vmatprep.mubr.f32.mxu0 %v83_v8  ;;  %677 = vmatpush3.bf16.msra.mxu0 %v674_v24 }
  0x77   :  { %679 = vmatprep.subr.bf16.mxu0 %v678_v27 }
  0x79   :  { %196 = vmatmul.mubr.f32.gmra.mrb[6].mxu0 %v82_v9 }
  0x7a   :  { %681 = vmatpush3.bf16.msra.mxu0 %v678_v27 }
  0x7b   :  { %683 = vmatprep.subr.bf16.mxu0 %v682_v30 }
  0x7e   :  { %685 = vmatpush3.bf16.msra.mxu0 %v682_v30 }
  0x7f   :  { %687 = vmatprep.subr.bf16.mxu0 %v686_v33 }
  0x82   :  { %689 = vmatpush3.bf16.msra.mxu0 %v686_v33 }
  0x83   :  { %691 = vmatprep.subr.bf16.mxu0 %v690_v36 }
  0x86   :  { %693 = vmatpush3.bf16.msra.mxu0 %v690_v36 }
  0x87   :  { %695 = vmatprep.subr.bf16.mxu0 %v694_v55 }
  0x8a   :  { %697 = vmatpush3.bf16.msra.mxu0 %v694_v55 }
 0x140   :  { %v474_v37 = vpop.f32.mrb[0].mxu0 }
 0x141   :  { %v475_v38 = vpop.f32.mrb[1].mxu0 }
 0x142   :  { %v476_v39 = vadd.f32 %v475_v38, %v474_v37 }
 0x144   :  { %v477_v40 = vpop.f32.mrb[2].mxu0  ;;  %v201_v41 = vmax.f32 %v476_v39, 0.0 }
 0x145   :  { %v478_v42 = vpop.f32.mrb[3].mxu0 }
 0x146   :  { %v479_v43 = vadd.f32 %v478_v42, %v477_v40  ;;  %558 = vmatprep.mubr.f32.mxu1 %v201_v41 }
 0x148   :  { %v202_v44 = vmax.f32 %v479_v43, 0.0  ;;  %v480_v45 = vpop.f32.mrb[4].mxu0 }
 0x149   :  { %v481_v46 = vpop.f32.mrb[5].mxu0 }
 0x14a   :  { %v482_v47 = vadd.f32 %v481_v46, %v480_v45  ;;  %559 = vmatmul.mubr.f32.vlgmr.msra.gmra.mrb[0].mxu1 %v202_v44 }
 0x14b   :  { %706 = vmatpush3.bf16.msra.mxu1 %v666_v19 }
 0x14c   :  { %v203_v48 = vmax.f32 %v482_v47, 0.0  ;;  %v483_v49 = vpop.f32.mrb[6].mxu0  ;;  %699 = vmatprep.subr.bf16.mxu1 %v670_v21 }
 0x14d   :  { %v484_v50 = vpop.f32.mrb[7].mxu0 }
 0x14e   :  { %v485_v51 = vadd.f32 %v484_v50, %v483_v49  ;;  %561 = vmatprep.mubr.f32.mxu1 %v203_v48 }
 0x14f   :  { %707 = vmatpush3.bf16.msra.mxu1 %v670_v21 }
 0x150   :  { %v204_v52 = vmax.f32 %v485_v51, 0.0  ;;  %700 = vmatprep.subr.bf16.mxu1 %v674_v24 }
 0x152   :  { %562 = vmatmul.mubr.f32.gmra.mrb[2].mxu1 %v204_v52 }
 0x153   :  { %708 = vmatpush3.bf16.msra.mxu1 %v674_v24 }
 0x154   :  { %701 = vmatprep.subr.bf16.mxu1 %v678_v27 }
 0x157   :  { %709 = vmatpush3.bf16.msra.mxu1 %v678_v27 }
 0x158   :  { %702 = vmatprep.subr.bf16.mxu1 %v682_v30 }
 0x15b   :  { %710 = vmatpush3.bf16.msra.mxu1 %v682_v30 }
 0x15c   :  { %703 = vmatprep.subr.bf16.mxu1 %v686_v33 }
 0x15f   :  { %711 = vmatpush3.bf16.msra.mxu1 %v686_v33 }
 0x160   :  { %704 = vmatprep.subr.bf16.mxu1 %v690_v36 }
 0x163   :  { %712 = vmatpush3.bf16.msra.mxu1 %v690_v36 }
 0x164   :  { %705 = vmatprep.subr.bf16.mxu1 %v694_v55 }
 0x167   :  { %713 = vmatpush3.bf16.msra.mxu1 %v694_v55 }
 0x21d   :  { %v560_v56 = vpop.f32.mrb[0].mxu1 }
 0x21e   :  { %v287_v57 = vpop.f32.mrb[1].mxu1  ;;  %v307_v59 = vmax.f32 %v560_v56, 0.0 }
 0x21f   :  { %v306_v58 = vmax.f32 %v287_v57, 0.0 }
 0x221   :  { %596 = vmatprep.mubr.f32.mxu0 %v306_v58 }
 0x222   :  { %597 = vmatmul.mubr.f32.vlgmr.msra.gmra.mrb[8].mxu0 %v307_v59 }
 0x225   :  { %v563_v60 = vpop.f32.mrb[2].mxu1 }
 0x226   :  { %v297_v61 = vpop.f32.mrb[3].mxu1  ;;  %v309_v63 = vmax.f32 %v563_v60, 0.0 }
 0x227   :  { %v308_v62 = vmax.f32 %v297_v61, 0.0 }
 0x229   :  { %599 = vmatprep.mubr.f32.mxu1 %v308_v62 }
 0x22a   :  { %600 = vmatmul.mubr.f32.vlgmr.msra.gmra.mrb[4].mxu1 %v309_v63 }
 0x2f5   :  { %v598_v1 = vpop.f32.mrb[8].mxu0 }
 0x2f6   :  { %v405_v2 = vadd.f32 %v598_v1, %v441_v0  ;;  %v399_v3 = vpop.f32.mrb[9].mxu0 }
 0x2f7   :  { %v400_v4 = vadd.f32 %v441_v0, %v399_v3 }
 0x2f8   :  { %419 = vst [vmem:[#allocation10 + $0x8] sm:$0xff] %v405_v2 }
 0x2f9   :  { %418 = vst [vmem:[#allocation10] sm:$0xff] %v400_v4 }
 0x2fd   :  { %v601_v5 = vpop.f32.mrb[4].mxu1 }
 0x2fe   :  { %v415_v6 = vadd.f32 %v601_v5, %v441_v0  ;;  %v409_v7 = vpop.f32.mrb[5].mxu1 }
 0x2ff   :  { %v410_v8 = vadd.f32 %v441_v0, %v409_v7 }
 0x300   :  { %421 = vst [vmem:[#allocation10 + $0x18] sm:$0xff] %v415_v6 }
 0x301   :  { %420 = vst [vmem:[#allocation10 + $0x10] sm:$0xff] %v410_v8 }
 0x302   :  { %822 = shalt.err (!%p819_p8)
}
 0x303   :  { %s823_s23 = scalar_lea.hbm %s967_s5, 512 }
 0x304   :  { %p824_p9 = scmp.ne.s32.totalorder %s967_s5, %s823_s23  ;;  %p827_p10 = scmp.lt.u32.totalorder %s823_s23, %s967_s5 }
 0x306   :  { %p829_p11 = pnand %p827_p10, %p824_p9 }
 0x308   :  { %832 = shalt.err (!%p829_p11)
}
 0x309   :  { %433 = dma.vmem_to_hbm [thread:$0]  %s428_s20, 512, %s967_s5, [#allocation4], %s842_s28, %s842_s28, %s843_s29  }
 0x30a   :  { %839 = dma.done.wait [#allocation4], 512  }
 0x30b   :  { %840 = vsyncadd [#allocation4], 4294966784 }
 0x30c   :  { %437 = vsyncpa [#allocation3], 1 }
 0x30d   :  { %438 = vsyncpa [#allocation6], 1 }
 0x30e   :  { %439 = vsyncpa [#allocation9], 1 }
 0x30f   :  { %440 = vsyncpa [#allocation4], 1 }

</bundles_post_ra>
